<compile_context>
chip_gen: v5e
topology: v5e:2x2
jax: 0.10.0
libtpu: 0.0.40
codegen_flags: <defaults>
</compile_context>

<pallas_src>
import functools

import jax
import jax.numpy as jnp
from jax.experimental import pallas as pl
from jax.experimental.pallas import tpu as pltpu

LANES = 128


def _loss_weighted_kernel(gt_ref, pred_ref, out_ref,
                          acc_m_ref, acc_d_ref, acc_dm_ref,
                          *, total_elems):
    i = pl.program_id(0)

    @pl.when(i == 0)
    def _():
        acc_m_ref[...] = jnp.zeros_like(acc_m_ref)
        acc_d_ref[...] = jnp.zeros_like(acc_d_ref)
        acc_dm_ref[...] = jnp.zeros_like(acc_dm_ref)

    g = gt_ref[...].astype(jnp.float32)
    p = pred_ref[...].astype(jnp.float32)

    # mask: 1.0 where gt != 0, else 0.0 (one cmp + select on the VPU)
    m = jnp.where(g != 0.0, jnp.float32(1.0), jnp.float32(0.0))
    d = (g - p) * (g - p)  # MSE(reduction='none')

    # VPU-only elementwise accumulation; no per-step XLU reductions / SMEM RMW.
    acc_m_ref[...] += m
    acc_d_ref[...] += d
    acc_dm_ref[...] += d * m

    @pl.when(i == pl.num_programs(0) - 1)
    def _():
        n = jnp.float32(total_elems)
        s0 = jnp.sum(acc_m_ref[...])
        ssq = jnp.sum(acc_d_ref[...])
        ssqm = jnp.sum(acc_dm_ref[...])
        c = s0 / n
        w = jnp.float32(1.0) - jnp.float32(2.0) * c
        mask_sum = w * s0 + c * n
        loss_sum = w * ssqm + c * ssq
        out_ref[0, 0] = loss_sum / mask_sum


def loss_weighted(gt, pred, *, target_block_rows=1024):
    """Weighted-MSE loss (LossWeighted.forward) as a single Pallas reduction."""
    assert gt.shape == pred.shape
    total = 1
    for s in gt.shape:
        total *= s
    assert total % LANES == 0, "pad inputs so numel is a multiple of 128"
    rows = total // LANES

    # Adaptive tile: entire array in one step for small inputs; otherwise up to
    # target_block_rows x 128 f32 (512 KiB per buffer, double-buffered -> 2 MiB
    # of input VMEM: safe under v5e/v6e/v7x scoped VMEM defaults).
    block_rows = min(target_block_rows, rows)
    pad_rows = (-rows) % block_rows  # 0 for the common/evenly-divisible case

    # Reshape only (no dtype upcast, no copy unless padding is required).
    gt2 = jnp.reshape(gt, (rows, LANES))
    pr2 = jnp.reshape(pred, (rows, LANES))
    if pad_rows:
        # zero padding is benign: gt=pred=0 contributes nothing to S0/SSQ/SSQM
        gt2 = jnp.pad(gt2, ((0, pad_rows), (0, 0)))
        pr2 = jnp.pad(pr2, ((0, pad_rows), (0, 0)))
    grid = ((rows + pad_rows) // block_rows,)

    kernel = functools.partial(_loss_weighted_kernel, total_elems=total)

    out = pl.pallas_call(
        kernel,
        out_shape=jax.ShapeDtypeStruct((1, 1), jnp.float32),
        grid_spec=pltpu.PrefetchScalarGridSpec(
            num_scalar_prefetch=0,
            grid=grid,
            in_specs=[
                pl.BlockSpec((block_rows, LANES), lambda i: (i, 0)),
                pl.BlockSpec((block_rows, LANES), lambda i: (i, 0)),
            ],
            out_specs=pl.BlockSpec((1, 1), lambda i: (0, 0),
                                   memory_space=pltpu.SMEM),
            scratch_shapes=[
                pltpu.VMEM((block_rows, LANES), jnp.float32),
                pltpu.VMEM((block_rows, LANES), jnp.float32),
                pltpu.VMEM((block_rows, LANES), jnp.float32),
            ],
        ),
        compiler_params=pltpu.CompilerParams(
            dimension_semantics=("arbitrary",)),
    )(gt2, pr2)
    return out[0, 0]


def loss_weighted_ref(gt, pred):
    gt = gt.astype(jnp.float32)
    pred = pred.astype(jnp.float32)
    mask = jnp.sign(jnp.abs(gt))
    c = jnp.sum(mask) / mask.size
    mask = (1.0 - 2.0 * c) * mask + c
    loss = (gt - pred) ** 2 * mask
    return jnp.sum(loss) / jnp.sum(mask)


if __name__ == "__main__":
    key = jax.random.PRNGKey(0)
    k1, k2, k3 = jax.random.split(key, 3)
    shape = (2, 4, 16, 16)  # batch=2, channels=4, spatial=16x16 (NCHW)
    # gt has a mix of zero and nonzero entries so the weighting is nontrivial
    gt_dense = jax.random.normal(k1, shape, dtype=jnp.float32)
    keep = jax.random.bernoulli(k3, p=0.6, shape=shape)
    gt = jnp.where(keep, gt_dense, 0.0)
    pred = jax.random.normal(k2, shape, dtype=jnp.float32)

    out = loss_weighted(gt, pred)
    out = jax.block_until_ready(out)

    ref = loss_weighted_ref(gt, pred)
    assert jnp.allclose(out, ref, rtol=1e-5, atol=1e-6), (out, ref)
    print("KERNEL_OK")
</pallas_src>

<mosaic_0001>
module attributes {stable_mosaic.version = 11 : i64} {
  func.func @_loss_weighted_kernel(%arg0: i32, %arg1: memref<16x128xf32, #tpu.memory_space<vmem>>, %arg2: memref<16x128xf32, #tpu.memory_space<vmem>>, %arg3: memref<1x1xf32, #tpu.memory_space<smem>>, %arg4: memref<16x128xf32, #tpu.memory_space<vmem>>, %arg5: memref<16x128xf32, #tpu.memory_space<vmem>>, %arg6: memref<16x128xf32, #tpu.memory_space<vmem>>) attributes {dimension_semantics = [#tpu.dimension_semantics<arbitrary>], iteration_bounds = array<i64: 1>, scalar_prefetch = 0 : i64, scratch_operands = 3 : i64, tpu.core_type = #tpu.core_type<tc>, window_params = [{transform_indices = @transform_0, window_bounds = array<i64: 16, 128>}, {transform_indices = @transform_1, window_bounds = array<i64: 16, 128>}, {transform_indices = @transform_2, window_bounds = array<i64: 1, 1>}]} {
    %c0_i32 = arith.constant 0 : i32
    %0 = arith.cmpi eq, %arg0, %c0_i32 : i32
    %1 = arith.extui %0 : i1 to i32
    %c0_i32_0 = arith.constant 0 : i32
    %2 = arith.cmpi ne, %1, %c0_i32_0 : i32
    scf.if %2 {
      %cst_20 = arith.constant 0.000000e+00 : f32
      %26 = vector.broadcast %cst_20 : f32 to vector<16x128xf32>
      %c0_21 = arith.constant 0 : index
      %c0_22 = arith.constant 0 : index
      %27 = vector.load %arg4[%c0_21, %c0_22] : memref<16x128xf32, #tpu.memory_space<vmem>>, vector<16x128xf32>
      tpu.vector_store %arg4[%c0_21, %c0_22], %26 {strides = array<i32>} : memref<16x128xf32, #tpu.memory_space<vmem>>, vector<16x128xf32>,
      %cst_23 = arith.constant 0.000000e+00 : f32
      %28 = vector.broadcast %cst_23 : f32 to vector<16x128xf32>
      %c0_24 = arith.constant 0 : index
      %c0_25 = arith.constant 0 : index
      %29 = vector.load %arg5[%c0_24, %c0_25] : memref<16x128xf32, #tpu.memory_space<vmem>>, vector<16x128xf32>
      tpu.vector_store %arg5[%c0_24, %c0_25], %28 {strides = array<i32>} : memref<16x128xf32, #tpu.memory_space<vmem>>, vector<16x128xf32>,
      %cst_26 = arith.constant 0.000000e+00 : f32
      %30 = vector.broadcast %cst_26 : f32 to vector<16x128xf32>
      %c0_27 = arith.constant 0 : index
      %c0_28 = arith.constant 0 : index
      %31 = vector.load %arg6[%c0_27, %c0_28] : memref<16x128xf32, #tpu.memory_space<vmem>>, vector<16x128xf32>
      tpu.vector_store %arg6[%c0_27, %c0_28], %30 {strides = array<i32>} : memref<16x128xf32, #tpu.memory_space<vmem>>, vector<16x128xf32>,
    } else {
    }
    %c0 = arith.constant 0 : index
    %c0_1 = arith.constant 0 : index
    %3 = vector.load %arg1[%c0, %c0_1] : memref<16x128xf32, #tpu.memory_space<vmem>>, vector<16x128xf32>
    %c0_2 = arith.constant 0 : index
    %c0_3 = arith.constant 0 : index
    %4 = vector.load %arg2[%c0_2, %c0_3] : memref<16x128xf32, #tpu.memory_space<vmem>>, vector<16x128xf32>
    %cst = arith.constant 0.000000e+00 : f32
    %5 = vector.broadcast %cst : f32 to vector<16x128xf32>
    %6 = arith.cmpf one, %3, %5 : vector<16x128xf32>
    %cst_4 = arith.constant 1.000000e+00 : f32
    %cst_5 = arith.constant 0.000000e+00 : f32
    %7 = vector.broadcast %cst_4 : f32 to vector<16x128xf32>
    %8 = vector.broadcast %cst_5 : f32 to vector<16x128xf32>
    %9 = arith.select %6, %7, %8 : vector<16x128xi1>, vector<16x128xf32>
    %10 = arith.subf %3, %4 : vector<16x128xf32>
    %11 = arith.subf %3, %4 : vector<16x128xf32>
    %12 = arith.mulf %10, %11 : vector<16x128xf32>
    %c0_6 = arith.constant 0 : index
    %c0_7 = arith.constant 0 : index
    %13 = vector.load %arg4[%c0_6, %c0_7] : memref<16x128xf32, #tpu.memory_space<vmem>>, vector<16x128xf32>
    %14 = arith.addf %13, %9 : vector<16x128xf32>
    %c0_8 = arith.constant 0 : index
    %c0_9 = arith.constant 0 : index
    %15 = vector.load %arg4[%c0_8, %c0_9] : memref<16x128xf32, #tpu.memory_space<vmem>>, vector<16x128xf32>
    tpu.vector_store %arg4[%c0_8, %c0_9], %14 {strides = array<i32>} : memref<16x128xf32, #tpu.memory_space<vmem>>, vector<16x128xf32>,
    %c0_10 = arith.constant 0 : index
    %c0_11 = arith.constant 0 : index
    %16 = vector.load %arg5[%c0_10, %c0_11] : memref<16x128xf32, #tpu.memory_space<vmem>>, vector<16x128xf32>
    %17 = arith.addf %16, %12 : vector<16x128xf32>
    %c0_12 = arith.constant 0 : index
    %c0_13 = arith.constant 0 : index
    %18 = vector.load %arg5[%c0_12, %c0_13] : memref<16x128xf32, #tpu.memory_space<vmem>>, vector<16x128xf32>
    tpu.vector_store %arg5[%c0_12, %c0_13], %17 {strides = array<i32>} : memref<16x128xf32, #tpu.memory_space<vmem>>, vector<16x128xf32>,
    %c0_14 = arith.constant 0 : index
    %c0_15 = arith.constant 0 : index
    %19 = vector.load %arg6[%c0_14, %c0_15] : memref<16x128xf32, #tpu.memory_space<vmem>>, vector<16x128xf32>
    %20 = arith.mulf %12, %9 : vector<16x128xf32>
    %21 = arith.addf %19, %20 : vector<16x128xf32>
    %c0_16 = arith.constant 0 : index
    %c0_17 = arith.constant 0 : index
    %22 = vector.load %arg6[%c0_16, %c0_17] : memref<16x128xf32, #tpu.memory_space<vmem>>, vector<16x128xf32>
    tpu.vector_store %arg6[%c0_16, %c0_17], %21 {strides = array<i32>} : memref<16x128xf32, #tpu.memory_space<vmem>>, vector<16x128xf32>,
    %c0_i32_18 = arith.constant 0 : i32
    %23 = arith.cmpi eq, %arg0, %c0_i32_18 : i32
    %24 = arith.extui %23 : i1 to i32
    %c0_i32_19 = arith.constant 0 : i32
    %25 = arith.cmpi ne, %24, %c0_i32_19 : i32
    scf.if %25 {
      %c0_20 = arith.constant 0 : index
      %c0_21 = arith.constant 0 : index
      %26 = vector.load %arg4[%c0_20, %c0_21] : memref<16x128xf32, #tpu.memory_space<vmem>>, vector<16x128xf32>
      %27 = vector.shape_cast %26 : vector<16x128xf32> to vector<1x16x128xf32>
      %cst_22 = arith.constant dense<0.000000e+00> : vector<1xf32>
      %28 = vector.multi_reduction <add>, %27, %cst_22 [1, 2] : vector<1x16x128xf32> to vector<1xf32>
      %29 = vector.shape_cast %28 : vector<1xf32> to vector<1x1x1xf32>
      %30 = vector.extract %29[0, 0, 0] : f32 from vector<1x1x1xf32>
      %c0_23 = arith.constant 0 : index
      %c0_24 = arith.constant 0 : index
      %31 = vector.load %arg5[%c0_23, %c0_24] : memref<16x128xf32, #tpu.memory_space<vmem>>, vector<16x128xf32>
      %32 = vector.shape_cast %31 : vector<16x128xf32> to vector<1x16x128xf32>
      %cst_25 = arith.constant dense<0.000000e+00> : vector<1xf32>
      %33 = vector.multi_reduction <add>, %32, %cst_25 [1, 2] : vector<1x16x128xf32> to vector<1xf32>
      %34 = vector.shape_cast %33 : vector<1xf32> to vector<1x1x1xf32>
      %35 = vector.extract %34[0, 0, 0] : f32 from vector<1x1x1xf32>
      %c0_26 = arith.constant 0 : index
      %c0_27 = arith.constant 0 : index
      %36 = vector.load %arg6[%c0_26, %c0_27] : memref<16x128xf32, #tpu.memory_space<vmem>>, vector<16x128xf32>
      %37 = vector.shape_cast %36 : vector<16x128xf32> to vector<1x16x128xf32>
      %cst_28 = arith.constant dense<0.000000e+00> : vector<1xf32>
      %38 = vector.multi_reduction <add>, %37, %cst_28 [1, 2] : vector<1x16x128xf32> to vector<1xf32>
      %39 = vector.shape_cast %38 : vector<1xf32> to vector<1x1x1xf32>
      %40 = vector.extract %39[0, 0, 0] : f32 from vector<1x1x1xf32>
      %cst_29 = arith.constant 2.048000e+03 : f32
      %41 = arith.divf %30, %cst_29 : f32
      %cst_30 = arith.constant 2.000000e+00 : f32
      %42 = arith.mulf %cst_30, %41 : f32
      %cst_31 = arith.constant 1.000000e+00 : f32
      %43 = arith.subf %cst_31, %42 : f32
      %44 = arith.mulf %43, %30 : f32
      %cst_32 = arith.constant 2.048000e+03 : f32
      %45 = arith.mulf %41, %cst_32 : f32
      %46 = arith.addf %44, %45 : f32
      %47 = arith.mulf %43, %40 : f32
      %48 = arith.mulf %41, %35 : f32
      %49 = arith.addf %47, %48 : f32
      %50 = arith.divf %49, %46 : f32
      %c0_33 = arith.constant 0 : index
      %c0_34 = arith.constant 0 : index
      %51 = memref.load %arg3[%c0_33, %c0_34] : memref<1x1xf32, #tpu.memory_space<smem>>
      memref.store %50, %arg3[%c0_33, %c0_34] : memref<1x1xf32, #tpu.memory_space<smem>>
    } else {
    }
    return
  }
  func.func @transform_0(%arg0: i32) -> (i32, i32) {
    %c0_i32 = arith.constant 0 : i32
    %c0_i32_0 = arith.constant 0 : i32
    return %arg0, %c0_i32 : i32, i32
  }
  func.func @transform_1(%arg0: i32) -> (i32, i32) {
    %c0_i32 = arith.constant 0 : i32
    %c0_i32_0 = arith.constant 0 : i32
    return %arg0, %c0_i32 : i32, i32
  }
  func.func @transform_2(%arg0: i32) -> (i32, i32) {
    %c0_i32 = arith.constant 0 : i32
    %c0_i32_0 = arith.constant 0 : i32
    %c0_i32_1 = arith.constant 0 : i32
    return %c0_i32, %c0_i32_0 : i32, i32
  }
}

</mosaic_0001>

<bundles_post_ra>
// kernel: tpu_custom_call.1
= control target key start
LH: loop header
LB: loop body
LE: loop exit
PB: predicated region body
PF: predicated region fallthrough
CT: control target
= control target key end

     0   :  { %7 = vsyncpa [#allocation6], 0  ;;  %s296_s0 = inlined_call_operand.hbm [shape: f32[16,128], index: 0, kind: input, shape index: {}]   ;;  %s297_s1 = inlined_call_operand.hbm [shape: f32[16,128], index: 1, kind: input, shape index: {}]   ;;  %s298_s2 = inlined_call_operand.hbm [shape: f32[1,1], index: 2, kind: output, shape index: {}]  }
   0x1   :  { %8 = vsyncpa [#allocation9], 0 }
   0x2   :  { %9 = vsyncpa [#allocation7], 0  ;;  %s14_s11 = sshll.u32 %s296_s0, 4  ;;  %s265_s12 = smov [#allocation5]   ;;  %s15_s11 = int_to_ptr.hbm [resolvable:$true] %s14_s11 }
   0x3   :  { %s16_s13 = sshll.u32 %s265_s12, 4  ;;  %s27_s16 = sshll.u32 %s297_s1, 4  ;;  %s17_s13 = int_to_ptr.vmem [resolvable:$true] %s16_s13  ;;  %s28_s16 = int_to_ptr.hbm [resolvable:$true] %s27_s16 }
   0x4   :  { %s266_s17 = smov 128   ;;  %s267_s18 = smov 8  }
   0x5   :  { %22 = dma.hbm_to_vmem [thread:$0]  %s15_s11, 256, %s17_s13, [#allocation6], %s266_s17, %s266_s17, %s267_s18  }
   0x6   :  { %s268_s19 = smov [#allocation8]  }
   0x7   :  { %s29_s20 = sshll.u32 %s268_s19, 4  ;;  %s30_s20 = int_to_ptr.vmem [resolvable:$true] %s29_s20 }
   0x8   :  { %35 = dma.hbm_to_vmem [thread:$0]  %s28_s16, 256, %s30_s20, [#allocation9], %s266_s17, %s266_s17, %s267_s18  }
   0x9   :  { %259 = dma.done.wait [#allocation6], 256  }
   0xa   :  { %260 = vsyncadd [#allocation6], 4294967040 }
   0xb   :  { %261 = dma.done.wait [#allocation9], 256  }
   0xc   :  { %262 = vsyncadd [#allocation9], 4294967040  ;;  %v54_v0 = vld [vmem:[#allocation5] sm:$0xff]  ;;  %v55_v1 = vld [vmem:[#allocation5 + $0x8] sm:$0xff]  ;;  %v269_v5 = vmov 0.0   ;;  %v270_v16 = vmov 2048.0  }
   0xd   :  { %v56_v2 = vld [vmem:[#allocation8] sm:$0xff]  ;;  %v57_v3 = vld [vmem:[#allocation8 + $0x8] sm:$0xff]  ;;  %vm58_vm0 = vcmp.ne.f32.partialorder %v54_v0, 0.0  ;;  %vm59_vm1 = vcmp.ne.f32.partialorder %v55_v1, 0.0  ;;  %195 = vrcp.f32 %v270_v16  ;;  %s166_s6 = sshll.u32 %s298_s2, 4  ;;  %s271_s9 = smov [#allocation10]   ;;  %s167_s6 = int_to_ptr.hbm [resolvable:$true] %s166_s6 }
   0xe   :  { %v62_v4 = vsub.f32 %v54_v0, %v56_v2  ;;  %v60_v6 = vsel %vm58_vm0, 1.0, %v269_v5  ;;  %v61_v7 = vsel %vm59_vm1, 1.0, %v269_v5  ;;  %v63_v8 = vsub.f32 %v55_v1, %v57_v3 }
   0xf   :  { %v91_v9 = vadd.f32 %v61_v7, %v60_v6 }
  0x10   :  { %v64_v10 = vmul.f32 %v62_v4, %v62_v4  ;;  %v65_v11 = vmul.f32 %v63_v8, %v63_v8 }
  0x11   :  { %92 = vadd.xlane.f32.xlu0 %v91_v9 }
  0x12   :  { %v80_v12 = vmul.f32 %v64_v10, %v60_v6  ;;  %v81_v13 = vmul.f32 %v65_v11, %v61_v7  ;;  %v103_v15 = vadd.f32 %v65_v11, %v64_v10 }
  0x13   :  { %v196_v18 = vpop.eup %195 }
  0x14   :  { %v115_v14 = vadd.f32 %v81_v13, %v80_v12  ;;  %v126_v21 = vmul.f32 2048.0, %v196_v18  ;;  %vm130_vm2 = vweird.f32 %v196_v18 }
  0x16   :  { %116 = vadd.xlane.f32.xlu1 %v115_v14  ;;  %v127_v28 = vsub.f32 1.0, %v126_v21 }
  0x18   :  { %v128_v35 = vmul.f32 %v196_v18, %v127_v28 }
  0x19   :  { %104 = vadd.xlane.f32.xlu0 %v103_v15 }
  0x1a   :  { %v129_v39 = vadd.f32 %v196_v18, %v128_v35 }
  0x1c   :  { %v131_v43 = vsel %vm130_vm2, %v196_v18, %v129_v39 }
  0x84   :  { %v93_v17 = vpop.xlane.xlu0 %92 }
  0x85   :  { %v94_v19 = vrot.slane %v93_v17, 4 }
  0x87   :  { %v95_v20 = vadd.f32 %v94_v19, %v93_v17 }
  0x89   :  { %v96_v22 = vrot.slane %v95_v20, 2  ;;  %v117_v23 = vpop.xlane.xlu1 %116 }
  0x8a   :  { %v118_v24 = vrot.slane %v117_v23, 4 }
  0x8b   :  { %v97_v25 = vadd.f32 %v96_v22, %v95_v20 }
  0x8c   :  { %v119_v26 = vadd.f32 %v118_v24, %v117_v23  ;;  %v105_v27 = vpop.xlane.xlu0 %104 }
  0x8d   :  { %v106_v29 = vrot.slane %v105_v27, 4  ;;  %v98_v30 = vrot.slane %v97_v25, 1 }
  0x8e   :  { %v120_v31 = vrot.slane %v119_v26, 2 }
  0x8f   :  { %v107_v32 = vadd.f32 %v106_v29, %v105_v27  ;;  %v99_v33 = vadd.f32 %v98_v30, %v97_v25 }
  0x90   :  { %v121_v34 = vadd.f32 %v120_v31, %v119_v26 }
  0x91   :  { %v108_v36 = vrot.slane %v107_v32, 2  ;;  %178 = vpush %v99_v33 }
  0x92   :  { %v122_v38 = vrot.slane %v121_v34, 1 }
  0x93   :  { %v109_v37 = vadd.f32 %v108_v36, %v107_v32 }
  0x94   :  { %v123_v42 = vadd.f32 %v122_v38, %v121_v34 }
  0x95   :  { %v110_v40 = vrot.slane %v109_v37, 1 }
  0x97   :  { %v111_v41 = vadd.f32 %v110_v40, %v109_v37 }
  0x99   :  { %180 = vpush %v111_v41 }
  0x9a   :  { %182 = vpush %v123_v42 }
  0x9b   :  { %184 = vpush %v131_v43 }
  0xc2   :  { %s179_s0 = spop %178 }
  0xca   :  { %s181_s1 = spop %180 }
  0xcb   :  { %s183_s21 = spop %182 }
  0xcc   :  { %s185_s22 = spop %184 }
  0xcd   :  { %s133_s23 = smul.f32 %s185_s22, %s179_s0 }
  0xcf   :  { %s134_s24 = smul.f32 2.0, %s133_s23 }
  0xd0   :  { %s140_s26 = smul.f32 %s181_s1, %s133_s23 }
  0xd1   :  { %s135_s25 = ssub.f32 1.0, %s134_s24  ;;  %s137_s27 = smul.f32 2048.0, %s133_s23 }
  0xd3   :  { %s136_s28 = smul.f32 %s179_s0, %s135_s25 }
  0xd4   :  { %s139_s29 = smul.f32 %s183_s21, %s135_s25 }
  0xd5   :  { %s138_s30 = sadd.f32 %s137_s27, %s136_s28 }
  0xd6   :  { %s141_s3 = sadd.f32 %s140_s26, %s139_s29 }
  0xd7   :  { %v142_v44 = vstv %s138_s30 }
  0xd8   :  { %197 = vrcp.f32 %v142_v44  ;;  %v154_v48 = vand.u32 2147483648, %v142_v44  ;;  %v152_v50 = vand.u32 2147483647, %v142_v44  ;;  %vm148_vm4 = vweird.f32 %v142_v44 }
  0xda   :  { %v155_v52 = vor.u32 1.1754944e-38, %v154_v48  ;;  %vm153_vm6 = vcmp.eq.f32.partialorder %v152_v50, 8.507059e+37 }
  0xde   :  { %v198_v45 = vpop.eup %197 }
  0xdf   :  { %v144_v46 = vmul.f32 %v198_v45, %v142_v44  ;;  %vm149_vm3 = vweird.f32 %v198_v45 }
  0xe0   :  { %vm150_vm5 = vmor %vm148_vm4, %vm149_vm3 }
  0xe1   :  { %v145_v47 = vsub.f32 1.0, %v144_v46 }
  0xe3   :  { %v146_v49 = vmul.f32 %v198_v45, %v145_v47 }
  0xe5   :  { %v147_v51 = vadd.f32 %v198_v45, %v146_v49 }
  0xe7   :  { %v151_v53 = vsel %vm150_vm5, %v198_v45, %v147_v51 }
  0xe8   :  { %v156_v54 = vsel %vm153_vm6, %v155_v52, %v151_v53 }
  0xe9   :  { %186 = vpush %v156_v54 }
 0x11a   :  { %s187_s7 = spop %186 }
 0x11b   :  { %s158_s8 = smul.f32 %s187_s7, %s141_s3 }
 0x11d   :  { %160 = sst [smem:[#allocation10]] %s158_s8 }
 0x11e   :  { %169 = dma.smem_to_hbm %s271_s9, 16, %s167_s6, [#allocation7]  }
 0x11f   :  { %263 = dma.done.wait [#allocation7], 16  }
 0x120   :  { %264 = vsyncadd [#allocation7], 4294967280 }
 0x121   :  { %174 = sfence }
 0x122   :  { %175 = vsyncpa [#allocation6], 1 }
 0x123   :  { %176 = vsyncpa [#allocation9], 1 }
 0x124   :  { %177 = vsyncpa [#allocation7], 1 }

</bundles_post_ra>
